<compile_context>
chip_gen: v5e
topology: v5e:2x2
jax: 0.10.0
libtpu: 0.0.40
codegen_flags: <defaults>
</compile_context>

<pallas_src>
import functools

import jax
import jax.numpy as jnp
from jax import lax
from jax.experimental import pallas as pl
from jax.experimental.pallas import tpu as pltpu


def _resblock_kernel(xp_ref, w3_ref, b3_ref, w1_ref, b1_ref, out_ref, *, W):
    # xp_ref : (1, Cin, L)        flat padded input, L = H*W + 2*(W+1)
    # w3_ref : (Cmid, 9*Cin)      3x3 weights, row order (kh, kw, cin)
    # b3_ref : (Cmid, 1)
    # w1_ref : (Cin, Cmid)        1x1 conv weights
    # b1_ref : (Cin, 1)
    # out_ref: (1, Cin, H*W)      lane-dense output (last dim multiple of 128)
    _, Cin, HW = out_ref.shape

    xp = xp_ref[0]                                     # (Cin, L) f32

    # Column index of every output pixel (for left/right border masking).
    col = lax.broadcasted_iota(jnp.int32, (Cin, HW), 1) % W
    not_left = col != 0            # taps looking one pixel left  (kw == 0)
    not_right = col != (W - 1)     # taps looking one pixel right (kw == 2)

    # im2col: each tap (kh, kw) is the flat image shifted by kh*W + kw lanes.
    taps = []
    for kh in range(3):
        for kw in range(3):
            s = kh * W + kw
            t = xp[:, s:s + HW]                        # (Cin, HW) lane shift
            if kw == 0:
                t = jnp.where(not_left, t, 0.0)
            elif kw == 2:
                t = jnp.where(not_right, t, 0.0)
            taps.append(t)
    patch = jnp.concatenate(taps, axis=0)              # (9*Cin, HW)

    # 3x3 conv as a single MXU matmul, f32 accumulation, then bias + ReLU.
    h = jnp.dot(w3_ref[...], patch, preferred_element_type=jnp.float32)
    h = jnp.maximum(h + b3_ref[...], 0.0)              # (Cmid, HW)

    # 1x1 conv (second matmul) + bias.
    y = jnp.dot(w1_ref[...], h, preferred_element_type=jnp.float32)
    y = y + b1_ref[...]                                # (Cin, HW)

    # Residual add (the unmasked center tap IS the original image) + ReLU.
    res = taps[4]                                      # (Cin, HW) == x
    out_ref[0] = jnp.maximum(y + res, 0.0).astype(out_ref.dtype)


def resblock_pallas(x_nchw, w3_oihw, b3, w1_oihw, b1):
    """x_nchw: (N, Cin, H, W) f32.  Weights in PyTorch OIHW layout."""
    N, Cin, H, W = x_nchw.shape
    Cmid = w3_oihw.shape[0]
    HW = H * W
    L = HW + 2 * (W + 1)

    # Free reshape (no transpose): NCHW -> (N, Cin, H*W); flat zero pad of
    # (W+1) on each side stands in for the 3x3 conv's spatial zero padding.
    x_flat = x_nchw.reshape(N, Cin, HW)
    x_pad = jnp.pad(x_flat, ((0, 0), (0, 0), (W + 1, W + 1)))   # (N, Cin, L)

    # Pre-flatten weights into dense 2-D, lane-friendly tiles.
    # w3_flat[m, (kh*3 + kw)*Cin + c] = w3[m, c, kh, kw]
    w3_flat = jnp.transpose(w3_oihw, (0, 2, 3, 1)).reshape(Cmid, 9 * Cin)
    w1_2d = w1_oihw.reshape(Cin, Cmid)
    b3_2d = b3.reshape(Cmid, 1)
    b1_2d = b1.reshape(Cin, 1)

    kernel = functools.partial(_resblock_kernel, W=W)

    out_flat = pl.pallas_call(
        kernel,
        out_shape=jax.ShapeDtypeStruct((N, Cin, HW), x_nchw.dtype),
        grid=(N,),
        in_specs=[
            pl.BlockSpec((1, Cin, L), lambda n: (n, 0, 0)),
            pl.BlockSpec((Cmid, 9 * Cin), lambda n: (0, 0)),
            pl.BlockSpec((Cmid, 1), lambda n: (0, 0)),
            pl.BlockSpec((Cin, Cmid), lambda n: (0, 0)),
            pl.BlockSpec((Cin, 1), lambda n: (0, 0)),
        ],
        out_specs=pl.BlockSpec((1, Cin, HW), lambda n: (n, 0, 0)),
        compiler_params=pltpu.CompilerParams(
            dimension_semantics=("parallel",)),   # N=2 parallel blocks (v7x: both TCs)
    )(x_pad, w3_flat, b3_2d, w1_2d, b1_2d)

    return out_flat.reshape(N, Cin, H, W)


def resblock_reference(x_nchw, w3_oihw, b3, w1_oihw, b1):
    """Pure-JAX NCHW reference matching the PyTorch ResBlock semantics."""
    h = lax.conv_general_dilated(
        x_nchw, w3_oihw, window_strides=(1, 1), padding="SAME",
        dimension_numbers=("NCHW", "OIHW", "NCHW"))
    h = jnp.maximum(h + b3[None, :, None, None], 0.0)
    y = lax.conv_general_dilated(
        h, w1_oihw, window_strides=(1, 1), padding="SAME",
        dimension_numbers=("NCHW", "OIHW", "NCHW"))
    y = y + b1[None, :, None, None]
    return jnp.maximum(y + x_nchw, 0.0)


if __name__ == "__main__":
    # Shapes implied by ResBlock(input_channels=4, channel=8), x: (2, 4, 16, 16)
    N, Cin, Cmid, H, W = 2, 4, 8, 16, 16

    key = jax.random.PRNGKey(0)
    kx, kw3, kb3, kw1, kb1 = jax.random.split(key, 5)

    x = jax.random.normal(kx, (N, Cin, H, W), dtype=jnp.float32)

    # Deterministic synthetic parameters in PyTorch Conv2d (OIHW) layout.
    fan3 = Cin * 3 * 3
    w3 = jax.random.uniform(kw3, (Cmid, Cin, 3, 3), jnp.float32,
                            minval=-1.0, maxval=1.0) / jnp.sqrt(fan3)
    b3 = jax.random.uniform(kb3, (Cmid,), jnp.float32,
                            minval=-1.0, maxval=1.0) / jnp.sqrt(fan3)
    fan1 = Cmid
    w1 = jax.random.uniform(kw1, (Cin, Cmid, 1, 1), jnp.float32,
                            minval=-1.0, maxval=1.0) / jnp.sqrt(fan1)
    b1 = jax.random.uniform(kb1, (Cin,), jnp.float32,
                            minval=-1.0, maxval=1.0) / jnp.sqrt(fan1)

    out = jax.block_until_ready(resblock_pallas(x, w3, b3, w1, b1))
    ref = jax.block_until_ready(resblock_reference(x, w3, b3, w1, b1))

    assert out.shape == (N, Cin, H, W)
    assert jnp.allclose(out, ref, atol=1e-4, rtol=1e-4), (
        "Pallas ResBlock mismatch vs JAX reference")

    print("KERNEL_OK")
</pallas_src>

<mosaic_0001>
module attributes {stable_mosaic.version = 11 : i64} {
  func.func @_resblock_kernel(%arg0: i32, %arg1: memref<1x4x290xf32, #tpu.memory_space<vmem>>, %arg2: memref<8x36xf32, #tpu.memory_space<vmem>>, %arg3: memref<8x1xf32, #tpu.memory_space<vmem>>, %arg4: memref<4x8xf32, #tpu.memory_space<vmem>>, %arg5: memref<4x1xf32, #tpu.memory_space<vmem>>, %arg6: memref<1x4x256xf32, #tpu.memory_space<vmem>>) attributes {dimension_semantics = [#tpu.dimension_semantics<parallel>], iteration_bounds = array<i64: 2>, scalar_prefetch = 0 : i64, scratch_operands = 0 : i64, tpu.core_type = #tpu.core_type<tc>, window_params = [{transform_indices = @transform_0, window_bounds = array<i64: 1, 4, 290>}, {pipeline_mode = #tpu.pipeline_mode<synchronous>, transform_indices = @transform_1, window_bounds = array<i64: 8, 36>}, {pipeline_mode = #tpu.pipeline_mode<synchronous>, transform_indices = @transform_2, window_bounds = array<i64: 8, 1>}, {pipeline_mode = #tpu.pipeline_mode<synchronous>, transform_indices = @transform_3, window_bounds = array<i64: 4, 8>}, {pipeline_mode = #tpu.pipeline_mode<synchronous>, transform_indices = @transform_4, window_bounds = array<i64: 4, 1>}, {transform_indices = @transform_5, window_bounds = array<i64: 1, 4, 256>}]} {
    %c0 = arith.constant 0 : index
    %c0_0 = arith.constant 0 : index
    %c0_1 = arith.constant 0 : index
    %0 = vector.load %arg1[%c0, %c0_0, %c0_1] : memref<1x4x290xf32, #tpu.memory_space<vmem>>, vector<1x4x290xf32>
    %1 = vector.shape_cast %0 : vector<1x4x290xf32> to vector<4x290xf32>
    %2 = tpu.iota {dimensions = array<i32: 1>} : vector<4x256xi32>
    %c16_i32 = arith.constant 16 : i32
    %c0_i32 = arith.constant 0 : i32
    %3 = arith.cmpi eq, %c16_i32, %c0_i32 : i32
    %c1_i32 = arith.constant 1 : i32
    %4 = arith.select %3, %c1_i32, %c16_i32 : i32
    %5 = vector.broadcast %4 : i32 to vector<4x256xi32>
    %6 = arith.remsi %2, %5 : vector<4x256xi32>
    %c0_i32_2 = arith.constant 0 : i32
    %7 = vector.broadcast %c0_i32_2 : i32 to vector<4x256xi32>
    %8 = arith.cmpi ne, %6, %7 : vector<4x256xi32>
    %c0_i32_3 = arith.constant 0 : i32
    %9 = vector.broadcast %c0_i32_3 : i32 to vector<4x256xi32>
    %10 = arith.cmpi slt, %6, %9 : vector<4x256xi32>
    %c0_i32_4 = arith.constant 0 : i32
    %11 = arith.cmpi slt, %4, %c0_i32_4 : i32
    %12 = vector.broadcast %11 : i1 to vector<4x256xi1>
    %13 = vector.broadcast %12 : vector<4x256xi1> to vector<4x256xi1>
    %14 = arith.xori %10, %13 : vector<4x256xi1>
    %15 = arith.andi %14, %8 : vector<4x256xi1>
    %16 = vector.broadcast %4 : i32 to vector<4x256xi32>
    %17 = arith.addi %6, %16 : vector<4x256xi32>
    %18 = arith.select %15, %17, %6 : vector<4x256xi1>, vector<4x256xi32>
    %c0_i32_5 = arith.constant 0 : i32
    %19 = vector.broadcast %c0_i32_5 : i32 to vector<4x256xi32>
    %20 = arith.cmpi ne, %18, %19 : vector<4x256xi32>
    %c15_i32 = arith.constant 15 : i32
    %21 = vector.broadcast %c15_i32 : i32 to vector<4x256xi32>
    %22 = arith.cmpi ne, %18, %21 : vector<4x256xi32>
    %23 = vector.extract_strided_slice %1 {offsets = [0, 0], sizes = [4, 256], strides = [1, 1]} : vector<4x290xf32> to vector<4x256xf32>
    %cst = arith.constant 0.000000e+00 : f32
    %24 = vector.broadcast %cst : f32 to vector<4x256xf32>
    %25 = arith.select %20, %23, %24 : vector<4x256xi1>, vector<4x256xf32>
    %26 = vector.extract_strided_slice %1 {offsets = [0, 1], sizes = [4, 256], strides = [1, 1]} : vector<4x290xf32> to vector<4x256xf32>
    %27 = vector.extract_strided_slice %1 {offsets = [0, 2], sizes = [4, 256], strides = [1, 1]} : vector<4x290xf32> to vector<4x256xf32>
    %cst_6 = arith.constant 0.000000e+00 : f32
    %28 = vector.broadcast %cst_6 : f32 to vector<4x256xf32>
    %29 = arith.select %22, %27, %28 : vector<4x256xi1>, vector<4x256xf32>
    %30 = vector.extract_strided_slice %1 {offsets = [0, 16], sizes = [4, 256], strides = [1, 1]} : vector<4x290xf32> to vector<4x256xf32>
    %cst_7 = arith.constant 0.000000e+00 : f32
    %31 = vector.broadcast %cst_7 : f32 to vector<4x256xf32>
    %32 = arith.select %20, %30, %31 : vector<4x256xi1>, vector<4x256xf32>
    %33 = vector.extract_strided_slice %1 {offsets = [0, 17], sizes = [4, 256], strides = [1, 1]} : vector<4x290xf32> to vector<4x256xf32>
    %34 = vector.extract_strided_slice %1 {offsets = [0, 18], sizes = [4, 256], strides = [1, 1]} : vector<4x290xf32> to vector<4x256xf32>
    %cst_8 = arith.constant 0.000000e+00 : f32
    %35 = vector.broadcast %cst_8 : f32 to vector<4x256xf32>
    %36 = arith.select %22, %34, %35 : vector<4x256xi1>, vector<4x256xf32>
    %37 = vector.extract_strided_slice %1 {offsets = [0, 32], sizes = [4, 256], strides = [1, 1]} : vector<4x290xf32> to vector<4x256xf32>
    %cst_9 = arith.constant 0.000000e+00 : f32
    %38 = vector.broadcast %cst_9 : f32 to vector<4x256xf32>
    %39 = arith.select %20, %37, %38 : vector<4x256xi1>, vector<4x256xf32>
    %40 = vector.extract_strided_slice %1 {offsets = [0, 33], sizes = [4, 256], strides = [1, 1]} : vector<4x290xf32> to vector<4x256xf32>
    %41 = vector.extract_strided_slice %1 {offsets = [0, 34], sizes = [4, 256], strides = [1, 1]} : vector<4x290xf32> to vector<4x256xf32>
    %cst_10 = arith.constant 0.000000e+00 : f32
    %42 = vector.broadcast %cst_10 : f32 to vector<4x256xf32>
    %43 = arith.select %22, %41, %42 : vector<4x256xi1>, vector<4x256xf32>
    %44 = tpu.concatenate %25, %26, %29, %32, %33, %36, %39, %40, %43 in 0 : vector<4x256xf32>, vector<4x256xf32>, vector<4x256xf32>, vector<4x256xf32>, vector<4x256xf32>, vector<4x256xf32>, vector<4x256xf32>, vector<4x256xf32>, vector<4x256xf32> -> vector<36x256xf32>
    %c0_11 = arith.constant 0 : index
    %c0_12 = arith.constant 0 : index
    %45 = vector.load %arg2[%c0_11, %c0_12] : memref<8x36xf32, #tpu.memory_space<vmem>>, vector<8x36xf32>
    %cst_13 = arith.constant dense<0.000000e+00> : vector<8x256xf32>
    %46 = tpu.matmul %45, %44, %cst_13 {dimension_numbers = #tpu.dot_dimension_numbers<[1], [0], [0], [1], [0, 0, 1, 1], [], []>} : vector<8x36xf32>, vector<36x256xf32>, vector<8x256xf32> -> vector<8x256xf32>
    %c0_14 = arith.constant 0 : index
    %c0_15 = arith.constant 0 : index
    %47 = vector.load %arg3[%c0_14, %c0_15] : memref<8x1xf32, #tpu.memory_space<vmem>>, vector<8x1xf32>
    %48 = vector.broadcast %47 : vector<8x1xf32> to vector<8x256xf32>
    %49 = arith.addf %46, %48 : vector<8x256xf32>
    %cst_16 = arith.constant 0.000000e+00 : f32
    %50 = vector.broadcast %cst_16 : f32 to vector<8x256xf32>
    %51 = arith.maximumf %49, %50 : vector<8x256xf32>
    %c0_17 = arith.constant 0 : index
    %c0_18 = arith.constant 0 : index
    %52 = vector.load %arg4[%c0_17, %c0_18] : memref<4x8xf32, #tpu.memory_space<vmem>>, vector<4x8xf32>
    %cst_19 = arith.constant dense<0.000000e+00> : vector<4x256xf32>
    %53 = tpu.matmul %52, %51, %cst_19 {dimension_numbers = #tpu.dot_dimension_numbers<[1], [0], [0], [1], [0, 0, 1, 1], [], []>} : vector<4x8xf32>, vector<8x256xf32>, vector<4x256xf32> -> vector<4x256xf32>
    %c0_20 = arith.constant 0 : index
    %c0_21 = arith.constant 0 : index
    %54 = vector.load %arg5[%c0_20, %c0_21] : memref<4x1xf32, #tpu.memory_space<vmem>>, vector<4x1xf32>
    %55 = vector.broadcast %54 : vector<4x1xf32> to vector<4x256xf32>
    %56 = arith.addf %53, %55 : vector<4x256xf32>
    %57 = arith.addf %56, %33 : vector<4x256xf32>
    %cst_22 = arith.constant 0.000000e+00 : f32
    %58 = vector.broadcast %cst_22 : f32 to vector<4x256xf32>
    %59 = arith.maximumf %57, %58 : vector<4x256xf32>
    %c0_23 = arith.constant 0 : index
    %c0_24 = arith.constant 0 : index
    %c0_25 = arith.constant 0 : index
    %60 = vector.load %arg6[%c0_23, %c0_24, %c0_25] : memref<1x4x256xf32, #tpu.memory_space<vmem>>, vector<1x4x256xf32>
    %61 = vector.shape_cast %60 : vector<1x4x256xf32> to vector<4x256xf32>
    %62 = vector.shape_cast %59 : vector<4x256xf32> to vector<1x4x256xf32>
    tpu.vector_store %arg6[%c0_23, %c0_24, %c0_25], %62 {strides = array<i32>} : memref<1x4x256xf32, #tpu.memory_space<vmem>>, vector<1x4x256xf32>,
    return
  }
  func.func @transform_0(%arg0: i32) -> (i32, i32, i32) {
    %c0_i32 = arith.constant 0 : i32
    %c0_i32_0 = arith.constant 0 : i32
    %c0_i32_1 = arith.constant 0 : i32
    return %arg0, %c0_i32, %c0_i32_0 : i32, i32, i32
  }
  func.func @transform_1(%arg0: i32) -> (i32, i32) {
    %c0_i32 = arith.constant 0 : i32
    %c0_i32_0 = arith.constant 0 : i32
    %c0_i32_1 = arith.constant 0 : i32
    return %c0_i32, %c0_i32_0 : i32, i32
  }
  func.func @transform_2(%arg0: i32) -> (i32, i32) {
    %c0_i32 = arith.constant 0 : i32
    %c0_i32_0 = arith.constant 0 : i32
    %c0_i32_1 = arith.constant 0 : i32
    return %c0_i32, %c0_i32_0 : i32, i32
  }
  func.func @transform_3(%arg0: i32) -> (i32, i32) {
    %c0_i32 = arith.constant 0 : i32
    %c0_i32_0 = arith.constant 0 : i32
    %c0_i32_1 = arith.constant 0 : i32
    return %c0_i32, %c0_i32_0 : i32, i32
  }
  func.func @transform_4(%arg0: i32) -> (i32, i32) {
    %c0_i32 = arith.constant 0 : i32
    %c0_i32_0 = arith.constant 0 : i32
    %c0_i32_1 = arith.constant 0 : i32
    return %c0_i32, %c0_i32_0 : i32, i32
  }
  func.func @transform_5(%arg0: i32) -> (i32, i32, i32) {
    %c0_i32 = arith.constant 0 : i32
    %c0_i32_0 = arith.constant 0 : i32
    %c0_i32_1 = arith.constant 0 : i32
    return %arg0, %c0_i32, %c0_i32_0 : i32, i32, i32
  }
}

</mosaic_0001>

<bundles_post_ra>
// kernel: tpu_custom_call.1
= control target key start
LH: loop header
LB: loop body
LE: loop exit
PB: predicated region body
PF: predicated region fallthrough
CT: control target
= control target key end

     0   :  { %10 = vsyncpa [#allocation3], 0  ;;  %s1179_s0 = inlined_call_operand.hbm [shape: f32[2,4,290], index: 0, kind: input, shape index: {}]   ;;  %s1180_s1 = inlined_call_operand.vmem [shape: f32[8,36], index: 1, kind: input, shape index: {}]   ;;  %s1181_s2 = inlined_call_operand.vmem [shape: f32[8,1], index: 2, kind: input, shape index: {}]   ;;  %s1182_s3 = inlined_call_operand.vmem [shape: f32[4,8], index: 3, kind: input, shape index: {}]   ;;  %s1183_s4 = inlined_call_operand.vmem [shape: f32[4,1], index: 4, kind: input, shape index: {}]   ;;  %s1184_s5 = inlined_call_operand.hbm [shape: f32[2,4,256], index: 5, kind: output, shape index: {}]  }
   0x1   :  { %12 = vsyncpa [#allocation3 + $0x1], 0 }
   0x2   :  { %13 = vsyncpa [#allocation4], 0 }
   0x3   :  { %15 = vsyncpa [#allocation4 + $0x1], 0  ;;  %s927_s18 = smov 0   ;;  %s929_s19 = smov 0  }
   0x4   :  { %s931_s20 = smov 0   ;;  %s933_s21 = smov 0  }
   0x5 LB: > { %s948_s22 = sadd.s32 4294967295, %s886_s21   ;;  %s677_s23 = sadd.s32 4294967294, %s886_s21   ;;  %s886_s21 = sphi %s933_s21, %s1200_s21   ;;  %s882_s20 = sphi %s931_s20, %s1199_s20   ;;  %s878_s19 = sphi %s929_s19, %s1198_s19   ;;  %s874_s18 = sphi %s927_s18, %s1197_s18  }
   0x6   : > { %s952_s24 = sadd.s32 1, %s886_s21   ;;  %s28_s25 = sadd.s32 1, %s882_s20 }
   0x7   : > { %s25_s26 = ssub.s32 %s886_s21, %s952_s24  ;;  %p35_p0 = scmp.ne.s32.totalorder %s882_s20, %s878_s19 }
   0x8   : > { %p26_p1 = scmp.eq.s32.totalorder %s25_s26, 0  ;;  %p36_p2 = scmp.eq.s32.totalorder %s886_s21, 0 }
   0x9   : > { %p41_p3 = scmp.ne.s32.totalorder %s878_s19, %s874_s18  ;;  %p42_p4 = scmp.eq.s32.totalorder %s948_s22, 0 }
   0xa   : > { %s964_s27 = scalar_select %p26_p1, %s882_s20, %s28_s25  }
   0xb   : > { %p37_p5 = por %p36_p2, %p35_p0  ;;  %p966_p6 = por %p42_p4, %p41_p3 }
   0xc   : > { %p149_p7 = scmp.eq.s32.totalorder %s948_s22, 1  ;;  %p155_p8 = scmp.eq.s32.totalorder %s677_s23, 1 }
   0xd   : > { %p679_p9 = scmp.ge.s32.totalorder %s886_s21, 2  ;;  %p710_p10 = scmp.lt.s32.totalorder %s886_s21, 2 }
   0xe   : > { %p973_p11 = por %p149_p7, %p35_p0  ;;  %p977_p12 = por %p155_p8, %p41_p3 }
   0xf   : > { %s187_s6 = sand.u32 1, %s882_s20   ;;  %s696_s7 = smul.u32 12, %s886_s21 }
  0x10   : > { %s695_s8 = smul.u32 12, %s187_s6  ;;  %p986_p13 = pnand %p710_p10, %p37_p5 }
  0x11   : > { %s196_s11 = scalar_lea.hbm %s1179_s0, %s696_s7  ;;  %s188_s16 = scalar_lea.sflag [#allocation3], %s187_s6 }
  0x12   : > { %s198_s13 = sshll.u32 %s196_s11, 4  ;;  %s191_s14 = scalar_lea.vmem [#allocation2], %s695_s8  ;;  %s199_s13 = int_to_ptr.hbm [resolvable:$true] %s198_s13 }
  0x13   : > { %s200_s15 = sshll.u32 %s191_s14, 4  ;;  %s790_s17 = sshra.s32 %s199_s13, 4  ;;  %s201_s15 = int_to_ptr.vmem [resolvable:$true] %s200_s15  ;;  %s791_s17 = int_to_ptr.hbm [resolvable:$true] %s790_s17 }
  0x14   : > { %s792_s23 = scalar_lea.hbm %s791_s17, 12  ;;  %p794_p1 = pneg %p986_p13 }
  0x15   : > { %p793_p0 = scmp.ne.s32.totalorder %s791_s17, %s792_s23  ;;  %s797_s7 = scalar_lea.hbm %s1179_s0, 24 }
  0x16   : > { %p798_p4 = scmp.lt.s32.totalorder %s791_s17, %s1179_s0  ;;  %p799_p5 = scmp.lt.s32.totalorder %s797_s7, %s792_s23 }
  0x17   : > { %p795_p2 = pnand %p794_p1, %p793_p0 }
  0x18   : > { %p800_p7 = por %p799_p5, %p798_p4 }
  0x19   : > { %p796_p3 = pneg %p795_p2 }
  0x1b   : > { %p801_p8 = pnand %p800_p7, %p796_p3 }
  0x1d   : > { %804 = shalt.err (!%p801_p8)
}
  0x1e   : > { %705 = dma.hbm_to_vmem [thread:$0]  (!%p986_p13), %s199_s13, 192, %s201_s15, %s188_s16  }
  0x1f   : > { %p681_p10 = scmp.ge.s32.totalorder %s886_s21, 1  ;;  %p205_p0 = scmp.lt.s32.totalorder %s886_s21, 3 }
  0x21   : > { %p206_p1 = pnand %p681_p10, %p205_p0 }
  0x22   : > { %s1003_s6 = sand.u32 (!%p206_p1), 1, %s878_s19  }
  0x23   : > { %209 = sbr.rel (%p206_p1) target bundleno = 513 (0x201), region = 40  ;;  %s212_s11 = scalar_lea.sflag (!%p206_p1), [#allocation3], %s1003_s6 }
  0x24   : > { %s697_s8 = smul.u32 (!%p206_p1), 12, %s1003_s6 }
  0x26   : > { %s215_s14 = scalar_lea.vmem (!%p206_p1), [#allocation2], %s697_s8 }
  0x28   : > { %865 = dma.done.wait (%p966_p6), %s212_s11, 192  }
  0x29   : > { %867 = vsyncadd (%p966_p6), %s212_s11, 4294967104  ;;  %v1011_v0 = vld [vmem:[%s215_s14] sm:$0xff]  ;;  %v1013_v1 = vld [vmem:[%s215_s14 + $0x8] sm:$0xf]  ;;  %s888_s28 = smov 126   ;;  %s889_s12 = smov 112   ;;  %v245_v39 = vlaneseq }
  0x2a   : > { %277 = vst [vmem:[#allocation1] ss:$2 sm:$0xff] %v1011_v0  ;;  %s890_s13 = smov 110   ;;  %s891_s15 = smov 96   ;;  %vm373_vm1 = vcmask 769024   ;;  %vm445_vm3 = vcmask 1043456  }
  0x2b   : > { %287 = vst [vmem:[#allocation1 + $0x10] ss:$2 sm:$0xff] %v1013_v1  ;;  %s892_s16 = smov 94   ;;  %s893_s17 = smov 111   ;;  %v246_v41 = vand.u32 127, %v245_v39  ;;  %vm440_vm5 = vcmask 777216  }
  0x2c   : > { %s894_s23 = smov 95   ;;  %s895_s25 = smov 127   ;;  %vm354_vm6 = vcmask 785408   ;;  %v455_v60 = vld [vmem:[%s1181_s2] sm:$0xff]  ;;  %vm316_vm7 = vcmask 916480   ;;  %vm335_vm8 = vcmask 900096  }
  0x2d   : > { %v247_v45 = vadd.s32 128, %v246_v41  ;;  %v252_v47 = vand.u32 15, %v246_v41  ;;  %vm297_vm9 = vcmask 1031168   ;;  %vm416_vm10 = vcmask 908288   ;;  %s840_s11 = scalar_lea.hbm %s1184_s5, 16 }
  0x2e   : > { %vm393_vm12 = vcmask 1039360   ;;  %vm461_vm13 = vcmask 293888   ;;  %vm520_vm14 = vcmask 64512  }
  0x2f   : > { %v259_v46 = vand.u32 15, %v247_v45  ;;  %vm1053_vm0 = vcmp.ne.s32.totalorder %v252_v47, 15  ;;  %vm1096_vm11 = vcmp.ne.s32.totalorder %v252_v47, 0 }
  0x31   : > { %v1017_v2 = vld.sshfl [vmem:[#allocation1] sm:$0xff pattern:$0x75316420]  ;;  %v1019_v3 = vld.sshfl [vmem:[#allocation1 + $0x8] sm:$0xff pattern:$0x75316420] }
  0x32   : > { %285 = vst [vmem:[#allocation1] ss:$2 sm:$0xff] %v1011_v0  ;;  %v290_v4 = vld.sshfl [vmem:[#allocation1 + $0x10] sm:$0xff pattern:$0x75316420]  ;;  %vm1059_vm2 = vcmp.ne.s32.totalorder %v259_v46, 15 }
  0x33   : > { %306 = vst [vmem:[#allocation1 + $0x10] ss:$2 sm:$0xff] %v1013_v1  ;;  %vm1063_vm4 = vcmp.ne.s32.totalorder %v259_v46, 0 }
  0x34   : > { %v283_v45 = vsel %vm1063_vm4, %v1019_v3, 0.0  ;;  %v282_v3 = vsel %vm1096_vm11, %v1017_v2, 0.0 }
  0x39   : > { %v1023_v5 = vld.sshfl [vmem:[#allocation1] sm:$0xff pattern:$0x75316420]  ;;  %v289_v6 = vld.sshfl [vmem:[#allocation1 + $0x8] sm:$0xff pattern:$0x75316420] }
  0x3a   : > { %304 = vst [vmem:[#allocation1] ss:$2 sm:$0xff] %v1011_v0  ;;  %v309_v7 = vld.sshfl [vmem:[#allocation1 + $0x10] sm:$0xff pattern:$0x75316420]  ;;  %v753_v8 = vpack.i.bf16 %v290_v4, %v289_v6 }
  0x3b   : > { %325 = vst [vmem:[#allocation1 + $0x10] ss:$2 sm:$0xff] %v1013_v1 }
  0x3c   : > { %754 = vrot.lane.b32.xlu2 %v753_v8, %s888_s28 }
  0x41   : > { %v308_v9 = vld.sshfl [vmem:[#allocation1 + $0x8] sm:$0xff pattern:$0x75316420]  ;;  %v307_v10 = vld.sshfl [vmem:[#allocation1] sm:$0xff pattern:$0x75316420] }
  0x42   : > { %v758_v11 = vpack.i.bf16 %v309_v7, %v308_v9  ;;  %323 = vst [vmem:[#allocation1] ss:$2 sm:$0xff] %v1011_v0  ;;  %v328_v12 = vld.sshfl [vmem:[#allocation1 + $0x10] sm:$0xff pattern:$0x75316420] }
  0x43   : > { %344 = vst [vmem:[#allocation1 + $0x10] ss:$2 sm:$0xff] %v1013_v1 }
  0x44   : > { %759 = vrot.lane.b32.xlu0 %v758_v11, %s889_s12 }
  0x49   : > { %v327_v13 = vld.sshfl [vmem:[#allocation1 + $0x8] sm:$0xff pattern:$0x75316420]  ;;  %v326_v14 = vld.sshfl [vmem:[#allocation1] sm:$0xff pattern:$0x75316420] }
  0x4a   : > { %v347_v15 = vld.sshfl [vmem:[#allocation1 + $0x10] sm:$0xff pattern:$0x75316420]  ;;  %v763_v16 = vpack.i.bf16 %v328_v12, %v327_v13  ;;  %342 = vst [vmem:[#allocation1] ss:$2 sm:$0xff] %v1011_v0 }
  0x4b   : > { %363 = vst [vmem:[#allocation1 + $0x10] ss:$2 sm:$0xff] %v1013_v1 }
  0x4c   : > { %764 = vrot.lane.b32.xlu1 %v763_v16, %s890_s13  ;;  %310 = vrot.lane.b32.xlu0 %v307_v10, %s889_s12  ;;  %s682_s12 = sshll.u32 %s1003_s6, 3 }
  0x51   : > { %v345_v17 = vld.sshfl [vmem:[#allocation1] sm:$0xff pattern:$0x75316420]  ;;  %v346_v18 = vld.sshfl [vmem:[#allocation1 + $0x8] sm:$0xff pattern:$0x75316420] }
  0x52   : > { %v366_v19 = vld.sshfl [vmem:[#allocation1 + $0x10] sm:$0xff pattern:$0x75316420]  ;;  %361 = vst [vmem:[#allocation1] ss:$2 sm:$0xff] %v1011_v0  ;;  %348 = vrot.lane.b32.xlu2 %v345_v17, %s891_s15  ;;  %v768_v20 = vpack.i.bf16 %v347_v15, %v346_v18 }
  0x53   : > { %383 = vst [vmem:[#allocation1 + $0x11] ss:$2 sm:$0xff] %v1013_v1 }
  0x54   : > { %329 = vrot.lane.b32.xlu1 %v326_v14, %s890_s13  ;;  %371 = vrot.lane.b32.xlu0 %v366_v19, %s892_s16  ;;  %s694_s13 = sshll.u32 %s948_s22, 3  ;;  %s591_s22 = scalar_lea.sflag [#allocation4], %s1003_s6 }
  0x59   : > { %v365_v21 = vld.sshfl [vmem:[#allocation1 + $0x8] sm:$0xff pattern:$0x75316420]  ;;  %v364_v22 = vld.sshfl [vmem:[#allocation1] sm:$0xff pattern:$0x75316420] }
  0x5a   : > { %v386_v23 = vld.sshfl [vmem:[#allocation1 + $0x10] sm:$0xff pattern:$0x75316420]  ;;  %381 = vst [vmem:[#allocation1 + $0x1] ss:$2 sm:$0xff] %v1011_v0  ;;  %367 = vrot.lane.b32.xlu2 %v364_v22, %s892_s16 }
  0x5b   : > { %406 = vst [vmem:[#allocation1 + $0x10] ss:$2 sm:$0xff] %v1013_v1 }
  0x5c   : > { %769 = vrot.lane.b32.xlu1 %v768_v20, %s891_s15  ;;  %369 = vrot.lane.b32.xlu0 %v365_v21, %s892_s16 }
  0x61   : > { %v384_v24 = vld.sshfl [vmem:[#allocation1] sm:$0xff pattern:$0x75316420]  ;;  %v385_v25 = vld.sshfl [vmem:[#allocation1 + $0x8] sm:$0xff pattern:$0x75316420] }
  0x62   : > { %404 = vst [vmem:[#allocation1] ss:$2 sm:$0xff] %v1011_v0  ;;  %v409_v26 = vld.sshfl [vmem:[#allocation1 + $0x10] sm:$0xff pattern:$0x75316420]  ;;  %v783_v31 = vpack.i.bf16 %v386_v23, %v385_v25 }
  0x63   : > { %430 = vst [vmem:[#allocation1 + $0x11] ss:$2 sm:$0xff] %v1013_v1 }
  0x69   : > { %v407_v27 = vld.sshfl [vmem:[#allocation1] sm:$0xff pattern:$0x75316420]  ;;  %v408_v28 = vld.sshfl [vmem:[#allocation1 + $0x8] sm:$0xff pattern:$0x75316420] }
  0x6a   : > { %410 = vrot.lane.b32.xlu1 %v407_v27, %s893_s17  ;;  %v773_v29 = vpack.i.bf16 %v409_v26, %v408_v28  ;;  %428 = vst [vmem:[#allocation1 + $0x1] ss:$2 sm:$0xff] %v1011_v0  ;;  %v433_v30 = vld.sshfl [vmem:[#allocation1 + $0x10] sm:$0xff pattern:$0x75316420] }
  0x6b   : > { %566 = vst [vmem:[#allocation1 + $0x10] ss:$2 sm:$0xff] %v1013_v1  ;;  %v896_v1 = vmov 0  }
  0x6c   : > { %774 = vrot.lane.b32.xlu0 %v773_v29, %s893_s17  ;;  %788 = vset.pattern.permute.xlu2 %v896_v1 }
  0x6d   : > { %789 = vset.pattern.permute.xlu0 %v896_v1 }
  0x71   : > { %v431_v32 = vld.sshfl [vmem:[#allocation1] sm:$0xff pattern:$0x75316420]  ;;  %v432_v33 = vld.sshfl [vmem:[#allocation1 + $0x8] sm:$0xff pattern:$0x75316420] }
  0x72   : > { %434 = vrot.lane.b32.xlu1 %v431_v32, %s894_s23  ;;  %v778_v34 = vpack.i.bf16 %v433_v30, %v432_v33  ;;  %564 = vst [vmem:[#allocation1] ss:$2 sm:$0xff] %v1011_v0 }
  0x74   : > { %784 = vrot.lane.b32.xlu0 %v783_v31, %s895_s25  ;;  %779 = vrot.lane.b32.xlu2 %v778_v34, %s894_s23  ;;  %s242_s23 = scalar_lea.vmem [#allocation5], %s682_s12 }
  0x79   : > { %v567_v2 = vld.sshfl [vmem:[#allocation1] sm:$0xff pattern:$0x75316420] }
  0x7a   : > { %387 = vrot.lane.b32.xlu1 %v384_v24, %s895_s25  ;;  %s604_s25 = sshll.u32 %s242_s23, 4  ;;  %s605_s25 = int_to_ptr.vmem [resolvable:$true] %s604_s25 }
  0x7c   : > { %291 = vrot.lane.b32.xlu2 %v1023_v5, %s888_s28 }
  0x84   : > { %458 = vperm.xlu2 %788, %v455_v60  }
  0x96   : > { %v1045_v35 = vpop.permute.xlu2 %754 }
  0x97   : > { %v757_v10 = vunpack.i.h.bf16 %v1045_v35  ;;  %v756_v11 = vunpack.i.l.bf16 %v1045_v35 }
  0x99   : > { %v299_v18 = vsel %vm297_vm9, %v756_v11, %v757_v10 }
  0x9a   : > { %v303_v26 = vsel %vm1059_vm2, %v299_v18, 0.0 }
  0xac   : > { %v1049_v37 = vpop.permute.xlu2 %348 }
  0xb4   : > { %v368_v42 = vpop.permute.xlu2 %367 }
  0xb6   : > { %v1047_v36 = vpop.permute.xlu0 %759 }
  0xb7   : > { %v762_v6 = vunpack.i.h.bf16 %v1047_v36  ;;  %v761_v7 = vunpack.i.l.bf16 %v1047_v36 }
  0xb9   : > { %v318_v13 = vsel %vm316_vm7, %v761_v7, %v762_v6 }
  0xba   : > { %v322_v16 = vsel %vm1063_vm4, %v318_v13, 0.0 }
  0xbb   : > { %v401_v23 = vrot.slane %v322_v16, 4 }
  0xbd   : > { %v449_v34 = vsel %vm445_vm3, %v303_v26, %v401_v23 }
  0xbe   : > { %v765_v38 = vpop.permute.xlu1 %764  ;;  %v1051_v40 = vpop.permute.xlu0 %310 }
  0xbf   : > { %v767_v8 = vunpack.i.h.bf16 %v765_v38  ;;  %v766_v9 = vunpack.i.l.bf16 %v765_v38  ;;  %v317_v28 = vsel %vm316_vm7, %v1051_v40, %v761_v7 }
  0xc0   : > { %v321_v35 = vsel %vm1096_vm11, %v317_v28, 0.0 }
  0xc1   : > { %v337_v12 = vsel %vm335_vm8, %v766_v9, %v767_v8  ;;  %v400_v46 = vrot.slane %v321_v35, 4 }
  0xc2   : > { %v341_v15 = vsel %vm1059_vm2, %v337_v12, 0.0 }
  0xc3   : > { %v424_v22 = vrot.slane %v341_v15, 4 }
  0xc6   : > { %v330_v43 = vpop.permute.xlu1 %329  ;;  %v372_v44 = vpop.permute.xlu0 %371 }
  0xc7   : > { %v336_v21 = vsel %vm335_vm8, %v330_v43, %v766_v9 }
  0xc8   : > { %v340_v31 = vsel %vm1053_vm0, %v336_v21, 0.0 }
  0xc9   : > { %v423_v39 = vrot.slane %v340_v31, 4 }
  0xce   : > { %v1057_v49 = vpop.permute.xlu2 %779  ;;  %v770_v50 = vpop.permute.xlu1 %769 }
  0xcf   : > { %v782_v53 = vunpack.i.h.bf16 %v1057_v49  ;;  %v781_v54 = vunpack.i.l.bf16 %v1057_v49  ;;  %v772_v55 = vunpack.i.h.bf16 %v770_v50  ;;  %v771_v56 = vunpack.i.l.bf16 %v770_v50  ;;  %v370_v57 = vpop.permute.xlu0 %369  ;;  %v454_v50 = vld [vmem:[%s1180_s1] sm:$0xff] }
  0xd0   : > { %v375_v58 = vsel %vm373_vm1, %v370_v57, %v372_v44  ;;  %v374_v59 = vsel %vm373_vm1, %v368_v42, %v370_v57  ;;  %v569_v57 = vld.sshfl [vmem:[#allocation1 + $0x10] sm:$0xff pattern:$0x75316420] }
  0xd1   : > { %v379_v61 = vsel %vm1059_vm2, %v375_v58, 0.0  ;;  %v356_v62 = vsel %vm354_vm6, %v771_v56, %v772_v55  ;;  %v442_v63 = vsel %vm440_vm5, %v781_v54, %v782_v53  ;;  %v378_v0 = vsel %vm1053_vm0, %v374_v59, 0.0  ;;  %v568_v55 = vld.sshfl [vmem:[#allocation1 + $0x8] sm:$0xff pattern:$0x75316420]  ;;  %574 = vrot.lane.b32.xlu2 %v569_v57, %s893_s17 }
  0xd2   : > { %685 = vmatpush.msk.msra.mxu1 %vm445_vm3, %v379_v61  ;;  %v360_v4 = vsel %vm1063_vm4, %v356_v62, 0.0  ;;  %683 = vmatpush.msk.msra.mxu0 %vm445_vm3, %v378_v0  ;;  %v355_v30 = vsel %vm354_vm6, %v1049_v37, %v771_v56  ;;  %v514_v56 = vld [vmem:[%s1183_s4] sm:$0xf] }
  0xd3   : > { %v453_v5 = vsel %vm445_vm3, %v360_v4, %v442_v63  ;;  %v359_v38 = vsel %vm1096_vm11, %v355_v30, 0.0  ;;  %572 = vrot.lane.b32.xlu1 %v568_v55, %s893_s17  ;;  %517 = vperm.xlu0 %789, %v514_v56   ;;  %v513_v62 = vld [vmem:[%s1182_s3] sm:$0xf] }
  0xd4   : > { %503 = vmatpush.msra.mxu1 %v453_v5 }
  0xd6   : > { %v292_v24 = vpop.permute.xlu2 %291 }
  0xd7   : > { %v298_v32 = vsel %vm297_vm9, %v292_v24, %v756_v11 }
  0xd8   : > { %v302_v44 = vsel %vm1053_vm0, %v298_v32, 0.0 }
  0xd9   : > { %v448_v51 = vsel %vm445_vm3, %v302_v44, %v400_v46 }
  0xdb   : > { %570 = vrot.lane.b32.xlu1 %v567_v2, %s893_s17  ;;  %s602_s17 = scalar_lea.hbm %s1184_s5, %s694_s13 }
  0xdc   : > { %v411_v14 = vpop.permute.xlu1 %410  ;;  %s606_s26 = sshll.u32 %s602_s17, 4  ;;  %s607_s26 = int_to_ptr.hbm [resolvable:$true] %s606_s26 }
  0xdd   : > { %s834_s7 = sshra.s32 %s607_s26, 4  ;;  %s835_s7 = int_to_ptr.hbm [resolvable:$true] %s834_s7 }
  0xde   : > { %v775_v17 = vpop.permute.xlu0 %774  ;;  %v459_v58 = vpop.permute.xlu2 %458  ;;  %s836_s9 = scalar_lea.hbm %s835_s7, 8  ;;  %p841_p3 = scmp.lt.s32.totalorder %s835_s7, %s1184_s5 }
  0xdf   : > { %v777_v19 = vunpack.i.h.bf16 %v775_v17  ;;  %v776_v20 = vunpack.i.l.bf16 %v775_v17  ;;  %p837_p6 = scmp.ne.s32.totalorder %s835_s7, %s836_s9  ;;  %p842_p4 = scmp.lt.s32.totalorder %s840_s11, %s836_s9 }
  0xe1   : > { %v418_v25 = vsel %vm416_vm10, %v776_v20, %v777_v19  ;;  %v417_v37 = vsel %vm416_vm10, %v411_v14, %v776_v20  ;;  %p838_p13 = pnand %p837_p6, %p973_p11  ;;  %p843_p5 = por %p842_p4, %p841_p3 }
  0xe2   : > { %v451_v29 = vsel %vm445_vm3, %v418_v25, %v424_v22  ;;  %v450_v47 = vsel %vm445_vm3, %v417_v37, %v423_v39 }
  0xe3   : > { %504 = vmatpush.msra.mxu1 %v451_v29  ;;  %p839_p2 = pneg %p838_p13 }
  0xe4   : > { %v435_v33 = vpop.permute.xlu1 %434 }
  0xe5   : > { %v441_v36 = vsel %vm440_vm5, %v435_v33, %v781_v54  ;;  %505 = vmatpush.msra.mxu1 %v449_v34  ;;  %p844_p7 = pnand %p843_p5, %p839_p2 }
  0xe6   : > { %v785_v40 = vpop.permute.xlu0 %784  ;;  %v452_v41 = vsel %vm445_vm3, %v359_v38, %v441_v36 }
  0xe7   : > { %v787_v42 = vunpack.i.h.bf16 %v785_v40  ;;  %v786_v43 = vunpack.i.l.bf16 %v785_v40  ;;  %483 = vmatpush.msra.mxu0 %v452_v41 }
  0xe9   : > { %484 = vmatpush.msra.mxu0 %v450_v47  ;;  %v395_v49 = vsel %vm393_vm12, %v786_v43, %v787_v42 }
  0xea   : > { %v447_v48 = vsel %vm445_vm3, %v283_v45, %v395_v49 }
  0xeb   : > { %485 = vmatpush.msra.mxu0 %v448_v51  ;;  %506 = vmatpush.msra.mxu1 %v447_v48 }
  0xec   : > { %686 = vmatmul.msk.f32.vlgmr.msra.gmra.mxu1 %vm461_vm13, %v454_v50  ;;  %v388_v52 = vpop.permute.xlu1 %387 }
  0xed   : > { %v394_v53 = vsel %vm393_vm12, %v388_v52, %v786_v43 }
  0xee   : > { %v446_v54 = vsel %vm445_vm3, %v282_v3, %v394_v53 }
  0xef   : > { %486 = vmatpush.msra.mxu0 %v446_v54 }
  0xf0   : > { %684 = vmatmul.msk.f32.vlgmr.msra.gmra.mxu0 %vm461_vm13, %v454_v50 }
 0x12b   : > { %v575_v6 = vpop.permute.xlu2 %574 }
 0x145   : > { %v573_v4 = vpop.permute.xlu1 %572  ;;  %v518_v5 = vpop.permute.xlu0 %517 }
 0x146   : > { %v577_v9 = vsel %vm416_vm10, %v573_v4, %v575_v6 }
 0x14d   : > { %v571_v10 = vpop.permute.xlu1 %570 }
 0x14e   : > { %v576_v15 = vsel %vm416_vm10, %v571_v10, %v573_v4 }
 0x169   : > { %v508_v59 = vpop.f32.mrf.mxu1 }
 0x16a   : > { %v509_v60 = vadd.f32 %v508_v59, %v459_v58 }
 0x16c   : > { %v512_v61 = vmax.f32 %v509_v60, 0.0 }
 0x16d   : > { %v488_v63 = vpop.f32.mrf.mxu0 }
 0x16e   : > { %559 = vmatpush.msra.mxu3 %v512_v61  ;;  %v489_v0 = vadd.f32 %v488_v63, %v459_v58 }
 0x16f   : > { %688 = vmatmul.msk.f32.vlgmr.msra.gmra.mxu3 %vm520_vm14, %v513_v62 }
 0x170   : > { %v511_v1 = vmax.f32 %v489_v0, 0.0 }
 0x172   : > { %539 = vmatpush.msra.mxu2 %v511_v1 }
 0x173   : > { %687 = vmatmul.msk.f32.vlgmr.msra.gmra.mxu2 %vm520_vm14, %v513_v62 }
 0x1f2   : > { %v561_v7 = vpop.f32.mrf.mxu3 }
 0x1f3   : > { %v562_v8 = vadd.f32 %v561_v7, %v518_v5 }
 0x1f5   : > { %v581_v11 = vadd.f32 %v577_v9, %v562_v8 }
 0x1f6   : > { %v541_v12 = vpop.f32.mrf.mxu2 }
 0x1f7   : > { %v583_v13 = vmax.f32 %v581_v11, 0.0  ;;  %v542_v14 = vadd.f32 %v541_v12, %v518_v5 }
 0x1f9   : > { %v580_v16 = vadd.f32 %v576_v15, %v542_v14  ;;  %v586_v17 = vrot.slane %v583_v13, 4 }
 0x1fb   : > { %v582_v18 = vmax.f32 %v580_v16, 0.0 }
 0x1fd   : > { %v587_v19 = vsel %vm445_vm3, %v582_v18, %v586_v17 }
 0x1fe   : > { %589 = vst [vmem:[%s242_s23] sm:$0xff] %v587_v19 }
 0x1ff   : > { %847 = shalt.err (!%p844_p7)
}
 0x200   : > { %700 = dma.vmem_to_hbm [thread:$0]  (%p973_p11), %s605_s25, 128, %s607_s26, %s591_s22  }
 0x201 PF: > { %s618_s6 = sand.u32 1, %s874_s18   ;;  %p707_p8 = pnand %p679_p9, %p977_p12 }
 0x202   : > { %s619_s12 = scalar_lea.sflag [#allocation4], %s618_s6 }
 0x203   : > { %p708_p10 = pneg %p707_p8 }
 0x205   : > { %869 = dma.done.wait (%p708_p10), %s619_s12, 128  }
 0x206   : > { %871 = vsyncadd (%p708_p10), %s619_s12, 4294967168  ;;  %p18_p0 = scmp.ge.s32.totalorder %s952_s24, 4   ;;  %s1197_s18 = smov %s878_s19 }
 0x207   : > { %s1198_s19 = smov %s882_s20  ;;  %s1199_s20 = smov %s964_s27 }
 0x208   : > { %s1200_s21 = smov %s952_s24  ;;  %20 = sbr.rel (!%p18_p0) target bundleno = 5 (0x5), region = 96 }
 0x20d   :  { %625 = vsyncpa [#allocation3], 1 }
 0x20e   :  { %627 = vsyncpa [#allocation3 + $0x1], 1 }
 0x20f   :  { %628 = vsyncpa [#allocation4], 1 }
 0x210   :  { %630 = vsyncpa [#allocation4 + $0x1], 1 }

</bundles_post_ra>
